<compile_context>
chip_gen: v6e
topology: v6e:2x2x1
jax: 0.10.0
libtpu: 0.0.40
codegen_flags: <defaults>
</compile_context>

<pallas_src>
import functools

import jax
import jax.numpy as jnp
from jax.experimental import pallas as pl
from jax.experimental.pallas import tpu as pltpu


_LANE = 128
_SUBLANE = 8

# TODO(synk): sweep pl.Buffered(3) on the stats-pass x input on v7x; off until measured.
_ENABLE_TRIPLE_BUFFER_STATS = False


# ------------------------- generation-aware budgets -------------------------

def _vmem_budget():
    """Return (vmem_capacity_bytes, target_block_bytes, vmem_limit_bytes)."""
    cap = 64 * 1024 * 1024            # conservative default (v7x-class) if query fails
    try:
        cap = int(pltpu.get_tpu_info().vmem_capacity_bytes)
    except Exception:
        pass
    if cap <= 64 * 1024 * 1024:       # v7x-class: 64 MiB physical VMEM per core
        target = 8 * 1024 * 1024
        limit = min(44 * 1024 * 1024, (3 * cap) // 4)
    else:                             # v5e / v6e: 128 MiB physical VMEM
        target = 12 * 1024 * 1024
        limit = min(64 * 1024 * 1024, cap // 2)
    return cap, target, limit


def _largest_divisor_tile(total, unit, cap):
    """Largest multiple of `unit` that divides `total` and is <= cap (>= unit)."""
    cap = max(unit, min(total, cap))
    best = unit
    t = unit
    while t <= cap:
        if total % t == 0:
            best = t
        t += unit
    return best


# ------------------------------ Pallas kernels ------------------------------

def _stats_kernel_acc(x_ref, sum_ref, sumsq_ref):
    """Per-row sum / sum-of-squares, accumulated over the lane (reduction) grid axis."""
    @pl.when(pl.program_id(1) == 0)
    def _():
        sum_ref[...] = jnp.zeros_like(sum_ref)
        sumsq_ref[...] = jnp.zeros_like(sumsq_ref)

    x = x_ref[...].astype(jnp.float32)
    sum_ref[...] += jnp.sum(x, axis=1, keepdims=True)
    sumsq_ref[...] += jnp.sum(x * x, axis=1, keepdims=True)


def _stats_kernel_oneshot(x_ref, sum_ref, sumsq_ref):
    """Per-row sum / sum-of-squares when a full row fits one block (no accumulator)."""
    x = x_ref[...].astype(jnp.float32)
    sum_ref[...] = jnp.sum(x, axis=1, keepdims=True)
    sumsq_ref[...] = jnp.sum(x * x, axis=1, keepdims=True)


def _normalize_kernel(x_ref, scale_ref, shift_ref, o_ref):
    """y = x * scale_row + shift_row (per-row affine, lane-dense blocks)."""
    x = x_ref[...].astype(jnp.float32)
    o_ref[...] = (x * scale_ref[...] + shift_ref[...]).astype(o_ref.dtype)


def _fused_kernel(x_ref, lrm_ref, lrv_ref, w_ref, b_ref, o_ref, *,
                  n, prior, eps, inv_m, unbias):
    """Single-read path: whole (N, C, L) tensor resident in VMEM.

    Per-channel batch stats + prior mixing + normalization in one kernel, so x is
    read from HBM exactly once and written exactly once.  The small batch loop is
    unrolled at trace time (path is only taken for n <= 16).
    """
    c = lrm_ref.shape[0]
    l = x_ref.shape[-1]

    s_cl = jnp.zeros((c, l), jnp.float32)
    q_cl = jnp.zeros((c, l), jnp.float32)
    for i in range(n):
        xi = x_ref[i].astype(jnp.float32)          # (C, L)
        s_cl = s_cl + xi
        q_cl = q_cl + xi * xi
    s = jnp.sum(s_cl, axis=1, keepdims=True)       # (C, 1)
    q = jnp.sum(q_cl, axis=1, keepdims=True)       # (C, 1)

    mean = s * inv_m
    var_b = jnp.maximum(q * inv_m - mean * mean, 0.0)
    var_u = var_b * unbias                          # PyTorch running_var is unbiased

    rm = prior * lrm_ref[...] + (1.0 - prior) * mean
    rv = prior * lrv_ref[...] + (1.0 - prior) * var_u
    inv_std = jax.lax.rsqrt(rv + eps)
    scale = w_ref[...] * inv_std                    # (C, 1)
    shift = b_ref[...] - rm * scale                 # (C, 1)

    for i in range(n):
        xi = x_ref[i].astype(jnp.float32)
        o_ref[i] = (xi * scale + shift).astype(o_ref.dtype)


def _x_stats_spec(block_shape, index_map, deep):
    """x input spec for the stats pass; optional 3-deep pipelining on v7x-class."""
    if deep and _ENABLE_TRIPLE_BUFFER_STATS and hasattr(pl, "Buffered"):
        try:
            return pl.BlockSpec(block_shape, index_map, pipeline_mode=pl.Buffered(3))
        except TypeError:
            pass
    return pl.BlockSpec(block_shape, index_map)


# --------------------------------- Wrapper ----------------------------------

def bayesian_batch_norm_3d(x, layer_running_mean, layer_running_var,
                           weight, bias, prior, eps=1e-5, *, force_two_pass=False):
    """x: (N, C, D, H, W). Returns BayesianBatchNorm3D forward output (same shape/dtype)."""
    N, C, D, H, W = x.shape
    L = D * H * W              # spatial elements per (n, c) row -> lane axis
    R = N * C                  # rows -> sublane / grid axis
    M = N * L                  # elements per channel
    itemsize = x.dtype.itemsize
    unbias = M / max(M - 1, 1)  # M == 1 guarded (returns biased var instead of NaN)

    cap, target_block, vmem_limit = _vmem_budget()
    prior = float(prior)
    eps = float(eps)

    lrm = layer_running_mean.astype(jnp.float32)
    lrv = layer_running_var.astype(jnp.float32)
    w = weight.astype(jnp.float32)
    b = bias.astype(jnp.float32)

    x_bytes = x.size * itemsize

    # ---------------- fused single-read path (VMEM-resident tensors) ----------------
    # ~6x headroom: x block + output block + f32 intermediates + pipeline buffers.
    if (not force_two_pass) and N <= 16 and x_bytes * 6 <= vmem_limit:
        x3 = x.reshape(N, C, L)            # free view, no transpose
        kernel = functools.partial(_fused_kernel, n=N, prior=prior, eps=eps,
                                   inv_m=1.0 / M, unbias=float(unbias))
        y3 = pl.pallas_call(
            kernel,
            out_shape=jax.ShapeDtypeStruct((N, C, L), x.dtype),
            grid_spec=pltpu.PrefetchScalarGridSpec(
                num_scalar_prefetch=0,
                grid=(1,),
                in_specs=[pl.BlockSpec((N, C, L), lambda i: (0, 0, 0)),
                          pl.BlockSpec((C, 1), lambda i: (0, 0)),
                          pl.BlockSpec((C, 1), lambda i: (0, 0)),
                          pl.BlockSpec((C, 1), lambda i: (0, 0)),
                          pl.BlockSpec((C, 1), lambda i: (0, 0))],
                out_specs=pl.BlockSpec((N, C, L), lambda i: (0, 0, 0)),
            ),
            compiler_params=pltpu.CompilerParams(
                dimension_semantics=("arbitrary",),
                vmem_limit_bytes=vmem_limit),
        )(x3, lrm.reshape(C, 1), lrv.reshape(C, 1), w.reshape(C, 1), b.reshape(C, 1))
        return y3.reshape(N, C, D, H, W)

    # ---------------- two-pass streaming path (large tensors) ----------------
    x2d = x.reshape(R, L)      # free view of native NCDHW layout: no transpose, NO pad

    # Lane tile: prefer the full row (contiguous DMA, no reduction grid axis).
    if L % _LANE == 0:
        if L * _SUBLANE * itemsize <= target_block:
            tl = L
        else:
            tl = _largest_divisor_tile(L, _LANE, target_block // (_SUBLANE * itemsize))
    else:
        tl = L   # BlockSpec full-dim exception: no lane padding / no HBM pad copy

    # Row tile: fill the block budget, but keep >= 2 row blocks when R >= 16 so both
    # v7x TensorCores get work on the row-parallel stats pass.
    if R % _SUBLANE == 0:
        row_cap = max(_SUBLANE, target_block // (tl * itemsize))
        if R >= 2 * _SUBLANE:
            row_cap = min(row_cap, max(_SUBLANE, (R // 2) // _SUBLANE * _SUBLANE))
        tr = _largest_divisor_tile(R, _SUBLANE, row_cap)
    else:
        tr = R   # full-dim exception: no row padding

    gr, gl = R // tr, L // tl
    block_bytes = tr * tl * itemsize
    # Normalize pass footprint ~ 4x block (x and y double-buffered); keep headroom.
    vmem_limit = min(max(vmem_limit, 5 * block_bytes + (1 << 20)), int(0.9 * cap))
    deep = cap <= 64 * 1024 * 1024   # v7x-class

    # ---- pass 1: per-row sum / sum-of-squares ----
    if gl == 1:
        stats_grid = (gr,)
        stats_dims = ("parallel",)
        stats_kernel = _stats_kernel_oneshot
        x_spec = _x_stats_spec((tr, tl), lambda i: (i, 0), deep)
        stats_out_specs = (pl.BlockSpec((tr, 1), lambda i: (i, 0)),
                           pl.BlockSpec((tr, 1), lambda i: (i, 0)))
    else:
        stats_grid = (gr, gl)
        stats_dims = ("parallel", "arbitrary")   # reduction axis last
        stats_kernel = _stats_kernel_acc
        x_spec = _x_stats_spec((tr, tl), lambda i, j: (i, j), deep)
        stats_out_specs = (pl.BlockSpec((tr, 1), lambda i, j: (i, 0)),
                           pl.BlockSpec((tr, 1), lambda i, j: (i, 0)))

    row_sum, row_sumsq = pl.pallas_call(
        stats_kernel,
        out_shape=(jax.ShapeDtypeStruct((R, 1), jnp.float32),
                   jax.ShapeDtypeStruct((R, 1), jnp.float32)),
        grid_spec=pltpu.PrefetchScalarGridSpec(
            num_scalar_prefetch=0,
            grid=stats_grid,
            in_specs=[x_spec],
            out_specs=stats_out_specs,
        ),
        compiler_params=pltpu.CompilerParams(
            dimension_semantics=stats_dims,
            vmem_limit_bytes=vmem_limit),
    )(x2d)

    # ---- tiny O(N*C) parameter math outside the kernels ----
    ch_sum = row_sum[:, 0].reshape(N, C).sum(axis=0)
    ch_sumsq = row_sumsq[:, 0].reshape(N, C).sum(axis=0)
    batch_mean = ch_sum / M
    batch_var_biased = jnp.maximum(ch_sumsq / M - batch_mean * batch_mean, 0.0)
    batch_var_unbiased = batch_var_biased * unbias

    running_mean = prior * lrm + (1.0 - prior) * batch_mean
    running_var = prior * lrv + (1.0 - prior) * batch_var_unbiased
    inv_std = jax.lax.rsqrt(running_var + eps)
    scale = w * inv_std                     # (C,)
    shift = b - running_mean * scale        # (C,)

    # Row r of x2d corresponds to channel r % C.
    scale_rows = jnp.tile(scale, N).reshape(R, 1)
    shift_rows = jnp.tile(shift, N).reshape(R, 1)

    # ---- pass 2: per-row affine normalization (lane-dense streaming FMA) ----
    y2d = pl.pallas_call(
        _normalize_kernel,
        out_shape=jax.ShapeDtypeStruct((R, L), x.dtype),
        grid_spec=pltpu.PrefetchScalarGridSpec(
            num_scalar_prefetch=0,
            grid=(gr, gl),
            in_specs=[pl.BlockSpec((tr, tl), lambda i, j: (i, j)),
                      pl.BlockSpec((tr, 1), lambda i, j: (i, 0)),
                      pl.BlockSpec((tr, 1), lambda i, j: (i, 0))],
            out_specs=pl.BlockSpec((tr, tl), lambda i, j: (i, j)),
        ),
        compiler_params=pltpu.CompilerParams(
            dimension_semantics=("parallel", "parallel"),
            vmem_limit_bytes=vmem_limit),
    )(x2d, scale_rows, shift_rows)

    return y2d.reshape(N, C, D, H, W)


# ---------------------------- Reference (pure JAX) ----------------------------

def _reference(x, layer_running_mean, layer_running_var, weight, bias, prior, eps=1e-5):
    axes = (0, 2, 3, 4)
    batch_mean = x.mean(axis=axes)
    batch_var_unbiased = x.var(axis=axes, ddof=1)
    running_mean = prior * layer_running_mean + (1.0 - prior) * batch_mean
    running_var = prior * layer_running_var + (1.0 - prior) * batch_var_unbiased
    rm = running_mean.reshape(1, -1, 1, 1, 1)
    rv = running_var.reshape(1, -1, 1, 1, 1)
    w = weight.reshape(1, -1, 1, 1, 1)
    b = bias.reshape(1, -1, 1, 1, 1)
    return (x - rm) / jnp.sqrt(rv + eps) * w + b


# ------------------------------------ Main ------------------------------------

if __name__ == "__main__":
    key = jax.random.PRNGKey(0)
    prior = 0.7
    eps = 1e-5

    def make_inputs(shape, k):
        k_x, k_m, k_v, k_w, k_b = jax.random.split(k, 5)
        C = shape[1]
        x = jax.random.normal(k_x, shape, dtype=jnp.float32) * 2.0 + 0.5
        lrm = jax.random.normal(k_m, (C,), dtype=jnp.float32) * 0.1
        lrv = jax.random.uniform(k_v, (C,), dtype=jnp.float32, minval=0.5, maxval=1.5)
        w = 1.0 + 0.1 * jax.random.normal(k_w, (C,), dtype=jnp.float32)
        b = 0.1 * jax.random.normal(k_b, (C,), dtype=jnp.float32)
        return x, lrm, lrv, w, b

    cases = [
        (2, 4, 4, 8, 8),    # aligned: R=8, L=256 (exercises fused + two-pass paths)
        (2, 3, 3, 7, 7),    # unaligned R=6, L=147: no-pad full-extent blocks
    ]
    for idx, shape in enumerate(cases):
        x, lrm, lrv, w, b = make_inputs(shape, jax.random.fold_in(key, idx))
        ref = _reference(x, lrm, lrv, w, b, prior, eps)
        for force_two_pass in (False, True):
            out = bayesian_batch_norm_3d(x, lrm, lrv, w, b, prior, eps,
                                         force_two_pass=force_two_pass)
            out = jax.block_until_ready(out)
            assert out.shape == x.shape and out.dtype == x.dtype
            assert jnp.allclose(out, ref, atol=1e-4, rtol=1e-4), (
                f"shape={shape} two_pass={force_two_pass} "
                f"max abs err {jnp.max(jnp.abs(out - ref))}")

    print("KERNEL_OK")
</pallas_src>

<mosaic_0001>
module attributes {stable_mosaic.version = 11 : i64} {
  func.func @_fused_kernel(%arg0: i32, %arg1: memref<2x4x256xf32, #tpu.memory_space<vmem>>, %arg2: memref<4x1xf32, #tpu.memory_space<vmem>>, %arg3: memref<4x1xf32, #tpu.memory_space<vmem>>, %arg4: memref<4x1xf32, #tpu.memory_space<vmem>>, %arg5: memref<4x1xf32, #tpu.memory_space<vmem>>, %arg6: memref<2x4x256xf32, #tpu.memory_space<vmem>>) attributes {dimension_semantics = [#tpu.dimension_semantics<arbitrary>], iteration_bounds = array<i64: 1>, scalar_prefetch = 0 : i64, scratch_operands = 0 : i64, tpu.core_type = #tpu.core_type<tc>, window_params = [{pipeline_mode = #tpu.pipeline_mode<synchronous>, transform_indices = @transform_0, window_bounds = array<i64: 2, 4, 256>}, {pipeline_mode = #tpu.pipeline_mode<synchronous>, transform_indices = @transform_1, window_bounds = array<i64: 4, 1>}, {pipeline_mode = #tpu.pipeline_mode<synchronous>, transform_indices = @transform_2, window_bounds = array<i64: 4, 1>}, {pipeline_mode = #tpu.pipeline_mode<synchronous>, transform_indices = @transform_3, window_bounds = array<i64: 4, 1>}, {pipeline_mode = #tpu.pipeline_mode<synchronous>, transform_indices = @transform_4, window_bounds = array<i64: 4, 1>}, {pipeline_mode = #tpu.pipeline_mode<synchronous>, transform_indices = @transform_5, window_bounds = array<i64: 2, 4, 256>}]} {
    %cst = arith.constant 0.000000e+00 : f32
    %0 = vector.broadcast %cst : f32 to vector<4x256xf32>
    %cst_0 = arith.constant 0.000000e+00 : f32
    %1 = vector.broadcast %cst_0 : f32 to vector<4x256xf32>
    %c0 = arith.constant 0 : index
    %c0_1 = arith.constant 0 : index
    %c0_2 = arith.constant 0 : index
    %2 = vector.load %arg1[%c0, %c0_1, %c0_2] : memref<2x4x256xf32, #tpu.memory_space<vmem>>, vector<1x4x256xf32>
    %3 = vector.shape_cast %2 : vector<1x4x256xf32> to vector<4x256xf32>
    %4 = arith.addf %0, %3 : vector<4x256xf32>
    %5 = arith.mulf %3, %3 : vector<4x256xf32>
    %6 = arith.addf %1, %5 : vector<4x256xf32>
    %c1 = arith.constant 1 : index
    %c0_3 = arith.constant 0 : index
    %c0_4 = arith.constant 0 : index
    %7 = vector.load %arg1[%c1, %c0_3, %c0_4] : memref<2x4x256xf32, #tpu.memory_space<vmem>>, vector<1x4x256xf32>
    %8 = vector.shape_cast %7 : vector<1x4x256xf32> to vector<4x256xf32>
    %9 = arith.addf %4, %8 : vector<4x256xf32>
    %10 = arith.mulf %8, %8 : vector<4x256xf32>
    %11 = arith.addf %6, %10 : vector<4x256xf32>
    %cst_5 = arith.constant dense<0.000000e+00> : vector<4xf32>
    %12 = vector.multi_reduction <add>, %9, %cst_5 [1] : vector<4x256xf32> to vector<4xf32>
    %13 = vector.shape_cast %12 : vector<4xf32> to vector<4x1xf32>
    %cst_6 = arith.constant dense<0.000000e+00> : vector<4xf32>
    %14 = vector.multi_reduction <add>, %11, %cst_6 [1] : vector<4x256xf32> to vector<4xf32>
    %15 = vector.shape_cast %14 : vector<4xf32> to vector<4x1xf32>
    %cst_7 = arith.constant 0.001953125 : f32
    %16 = vector.broadcast %cst_7 : f32 to vector<4x1xf32>
    %17 = arith.mulf %13, %16 : vector<4x1xf32>
    %cst_8 = arith.constant 0.001953125 : f32
    %18 = vector.broadcast %cst_8 : f32 to vector<4x1xf32>
    %19 = arith.mulf %15, %18 : vector<4x1xf32>
    %20 = arith.mulf %17, %17 : vector<4x1xf32>
    %21 = arith.subf %19, %20 : vector<4x1xf32>
    %cst_9 = arith.constant 0.000000e+00 : f32
    %22 = vector.broadcast %cst_9 : f32 to vector<4x1xf32>
    %23 = arith.maximumf %21, %22 : vector<4x1xf32>
    %cst_10 = arith.constant 1.00195694 : f32
    %24 = vector.broadcast %cst_10 : f32 to vector<4x1xf32>
    %25 = arith.mulf %23, %24 : vector<4x1xf32>
    %c0_11 = arith.constant 0 : index
    %c0_12 = arith.constant 0 : index
    %26 = vector.load %arg2[%c0_11, %c0_12] : memref<4x1xf32, #tpu.memory_space<vmem>>, vector<4x1xf32>
    %cst_13 = arith.constant 0.699999988 : f32
    %27 = vector.broadcast %cst_13 : f32 to vector<4x1xf32>
    %28 = arith.mulf %27, %26 : vector<4x1xf32>
    %cst_14 = arith.constant 3.000000e-01 : f32
    %29 = vector.broadcast %cst_14 : f32 to vector<4x1xf32>
    %30 = arith.mulf %29, %17 : vector<4x1xf32>
    %31 = arith.addf %28, %30 : vector<4x1xf32>
    %c0_15 = arith.constant 0 : index
    %c0_16 = arith.constant 0 : index
    %32 = vector.load %arg3[%c0_15, %c0_16] : memref<4x1xf32, #tpu.memory_space<vmem>>, vector<4x1xf32>
    %cst_17 = arith.constant 0.699999988 : f32
    %33 = vector.broadcast %cst_17 : f32 to vector<4x1xf32>
    %34 = arith.mulf %33, %32 : vector<4x1xf32>
    %cst_18 = arith.constant 3.000000e-01 : f32
    %35 = vector.broadcast %cst_18 : f32 to vector<4x1xf32>
    %36 = arith.mulf %35, %25 : vector<4x1xf32>
    %37 = arith.addf %34, %36 : vector<4x1xf32>
    %cst_19 = arith.constant 9.99999974E-6 : f32
    %38 = vector.broadcast %cst_19 : f32 to vector<4x1xf32>
    %39 = arith.addf %37, %38 : vector<4x1xf32>
    %40 = math.rsqrt %39 : vector<4x1xf32>
    %c0_20 = arith.constant 0 : index
    %c0_21 = arith.constant 0 : index
    %41 = vector.load %arg4[%c0_20, %c0_21] : memref<4x1xf32, #tpu.memory_space<vmem>>, vector<4x1xf32>
    %42 = arith.mulf %41, %40 : vector<4x1xf32>
    %c0_22 = arith.constant 0 : index
    %c0_23 = arith.constant 0 : index
    %43 = vector.load %arg5[%c0_22, %c0_23] : memref<4x1xf32, #tpu.memory_space<vmem>>, vector<4x1xf32>
    %44 = arith.mulf %31, %42 : vector<4x1xf32>
    %45 = arith.subf %43, %44 : vector<4x1xf32>
    %c0_24 = arith.constant 0 : index
    %c0_25 = arith.constant 0 : index
    %c0_26 = arith.constant 0 : index
    %46 = vector.load %arg1[%c0_24, %c0_25, %c0_26] : memref<2x4x256xf32, #tpu.memory_space<vmem>>, vector<1x4x256xf32>
    %47 = vector.shape_cast %46 : vector<1x4x256xf32> to vector<4x256xf32>
    %48 = vector.broadcast %42 : vector<4x1xf32> to vector<4x256xf32>
    %49 = arith.mulf %47, %48 : vector<4x256xf32>
    %50 = vector.broadcast %45 : vector<4x1xf32> to vector<4x256xf32>
    %51 = arith.addf %49, %50 : vector<4x256xf32>
    %c0_27 = arith.constant 0 : index
    %c0_28 = arith.constant 0 : index
    %c0_29 = arith.constant 0 : index
    %52 = vector.load %arg6[%c0_27, %c0_28, %c0_29] : memref<2x4x256xf32, #tpu.memory_space<vmem>>, vector<1x4x256xf32>
    %53 = vector.shape_cast %52 : vector<1x4x256xf32> to vector<4x256xf32>
    %54 = vector.shape_cast %51 : vector<4x256xf32> to vector<1x4x256xf32>
    tpu.vector_store %arg6[%c0_27, %c0_28, %c0_29], %54 {strides = array<i32>} : memref<2x4x256xf32, #tpu.memory_space<vmem>>, vector<1x4x256xf32>,
    %c1_30 = arith.constant 1 : index
    %c0_31 = arith.constant 0 : index
    %c0_32 = arith.constant 0 : index
    %55 = vector.load %arg1[%c1_30, %c0_31, %c0_32] : memref<2x4x256xf32, #tpu.memory_space<vmem>>, vector<1x4x256xf32>
    %56 = vector.shape_cast %55 : vector<1x4x256xf32> to vector<4x256xf32>
    %57 = vector.broadcast %42 : vector<4x1xf32> to vector<4x256xf32>
    %58 = arith.mulf %56, %57 : vector<4x256xf32>
    %59 = vector.broadcast %45 : vector<4x1xf32> to vector<4x256xf32>
    %60 = arith.addf %58, %59 : vector<4x256xf32>
    %c1_33 = arith.constant 1 : index
    %c0_34 = arith.constant 0 : index
    %c0_35 = arith.constant 0 : index
    %61 = vector.load %arg6[%c1_33, %c0_34, %c0_35] : memref<2x4x256xf32, #tpu.memory_space<vmem>>, vector<1x4x256xf32>
    %62 = vector.shape_cast %61 : vector<1x4x256xf32> to vector<4x256xf32>
    %63 = vector.shape_cast %60 : vector<4x256xf32> to vector<1x4x256xf32>
    tpu.vector_store %arg6[%c1_33, %c0_34, %c0_35], %63 {strides = array<i32>} : memref<2x4x256xf32, #tpu.memory_space<vmem>>, vector<1x4x256xf32>,
    return
  }
  func.func @transform_0(%arg0: i32) -> (i32, i32, i32) {
    %c0_i32 = arith.constant 0 : i32
    %c0_i32_0 = arith.constant 0 : i32
    %c0_i32_1 = arith.constant 0 : i32
    %c0_i32_2 = arith.constant 0 : i32
    return %c0_i32, %c0_i32_0, %c0_i32_1 : i32, i32, i32
  }
  func.func @transform_1(%arg0: i32) -> (i32, i32) {
    %c0_i32 = arith.constant 0 : i32
    %c0_i32_0 = arith.constant 0 : i32
    %c0_i32_1 = arith.constant 0 : i32
    return %c0_i32, %c0_i32_0 : i32, i32
  }
  func.func @transform_2(%arg0: i32) -> (i32, i32) {
    %c0_i32 = arith.constant 0 : i32
    %c0_i32_0 = arith.constant 0 : i32
    %c0_i32_1 = arith.constant 0 : i32
    return %c0_i32, %c0_i32_0 : i32, i32
  }
  func.func @transform_3(%arg0: i32) -> (i32, i32) {
    %c0_i32 = arith.constant 0 : i32
    %c0_i32_0 = arith.constant 0 : i32
    %c0_i32_1 = arith.constant 0 : i32
    return %c0_i32, %c0_i32_0 : i32, i32
  }
  func.func @transform_4(%arg0: i32) -> (i32, i32) {
    %c0_i32 = arith.constant 0 : i32
    %c0_i32_0 = arith.constant 0 : i32
    %c0_i32_1 = arith.constant 0 : i32
    return %c0_i32, %c0_i32_0 : i32, i32
  }
  func.func @transform_5(%arg0: i32) -> (i32, i32, i32) {
    %c0_i32 = arith.constant 0 : i32
    %c0_i32_0 = arith.constant 0 : i32
    %c0_i32_1 = arith.constant 0 : i32
    %c0_i32_2 = arith.constant 0 : i32
    return %c0_i32, %c0_i32_0, %c0_i32_1 : i32, i32, i32
  }
}

</mosaic_0001>

<bundles_post_ra>
// kernel: tpu_custom_call.1
= control target key start
LH: loop header
LB: loop body
LE: loop exit
PB: predicated region body
PF: predicated region fallthrough
CT: control target
= control target key end

     0   :  { %vm33_vm0 = vcmask 1043456   ;;  %s205_s0 = inlined_call_operand.vmem [shape: f32[2,4,256], index: 0, kind: input, shape index: {}]   ;;  %s206_s1 = inlined_call_operand.vmem [shape: f32[4,1], index: 1, kind: input, shape index: {}]   ;;  %s207_s2 = inlined_call_operand.vmem [shape: f32[4,1], index: 2, kind: input, shape index: {}]   ;;  %s208_s3 = inlined_call_operand.vmem [shape: f32[4,1], index: 3, kind: input, shape index: {}]   ;;  %s209_s4 = inlined_call_operand.vmem [shape: f32[4,1], index: 4, kind: input, shape index: {}]   ;;  %s210_s5 = inlined_call_operand.hbm [shape: f32[2,4,256], index: 5, kind: output, shape index: {}]  }
   0x1   :  { %v21_v0 = vld [vmem:[%s205_s0] sm:$0xff]  ;;  %v116_v1 = vld [vmem:[%s205_s0 + $0x8] sm:$0xff] }
   0x2   :  { %v27_v2 = vadd.f32 %v116_v1, %v21_v0  ;;  %v28_v3 = vmul.f32 %v116_v1, %v116_v1  ;;  %v23_v4 = vmul.f32 %v21_v0, %v21_v0 }
   0x3   :  { %10 = vsyncpa [#allocation3], 0  ;;  %v149_v14 = vmov 0   ;;  %v57_v21 = vld [vmem:[%s207_s2] sm:$0xf]  ;;  %v75_v40 = vlaneseq }
   0x4   :  { %v31_v5 = vcombine.high %v27_v2, %v27_v2  ;;  %v34_v6 = vsel %vm33_vm0, %v27_v2, 0.0  ;;  %v29_v7 = vadd.f32 %v28_v3, %v23_v4  ;;  %123 = vset.pattern.permute.xlu1 %v149_v14  ;;  %124 = vset.pattern.permute.xlu0 %v149_v14  ;;  %v58_v23 = vmul.f32 0.7, %v57_v21  ;;  %v53_v28 = vld [vmem:[%s206_s1] sm:$0xf]  ;;  %s151_s1 = smov [#allocation2]  }
   0x5   :  { %v54_v29 = vmul.f32 0.7, %v53_v28  ;;  %v63_v31 = vld [vmem:[%s208_s3] sm:$0xf]  ;;  %v150_v38 = vmov 839922192  }
   0x6   :  { %v35_v8 = vsel %vm33_vm0, %v31_v5, 0.0  ;;  %v40_v9 = vcombine.high %v29_v7, %v29_v7  ;;  %v42_v10 = vsel %vm33_vm0, %v29_v7, 0.0  ;;  %v65_v35 = vld [vmem:[%s209_s4] sm:$0xf]  ;;  %v73_v39 = vunpack.c.l.s4 %v150_v38  ;;  %s105_s3 = sshll.u32 %s151_s1, 4  ;;  %s106_s3 = int_to_ptr.vmem [resolvable:$true] %s105_s3 }
   0x7   :  { %v36_v11 = vadd.f32 %v35_v8, %v34_v6  ;;  %v76_v42 = vshrl.u32 %v75_v40, 7  ;;  %s127_s4 = scalar_lea.vmem %s106_s3, 256  ;;  %p132_p1 = scmp.lt.s32.totalorder %s106_s3, %s106_s3 }
   0x8   :  { %v43_v12 = vsel %vm33_vm0, %v40_v9, 0.0  ;;  %v74_v41 = vunpack.c.0.s8 %v73_v39  ;;  %p128_p0 = scmp.ne.s32.totalorder %s106_s3, %s127_s4  ;;  %p133_p2 = scmp.lt.s32.totalorder %s127_s4, %s127_s4 }
   0x9   :  { %37 = vadd.xlane.f32.xlu0 %v36_v11  ;;  %v44_v13 = vadd.f32 %v43_v12, %v42_v10 }
   0xa   :  { %v77_v43 = vsub.s32 %v74_v41, %v76_v42  ;;  %p134_p3 = por %p133_p2, %p132_p1 }
   0xc   :  { %p135_p4 = pnand %p134_p3, %p128_p0 }
   0xd   :  { %45 = vadd.xlane.f32.xlu0 %v44_v13 }
  0x92   :  { %v38_v15 = vpop.xlane.xlu0 %37 }
  0x93   :  { %v47_v16 = vmul.f32 0.001953125, %v38_v15 }
  0x95   :  { %v49_v18 = vmul.f32 %v47_v16, %v47_v16  ;;  %v55_v30 = vmul.f32 0.3, %v47_v16 }
  0x96   :  { %v46_v17 = vpop.xlane.xlu0 %45 }
  0x97   :  { %v48_v19 = vmul.f32 0.001953125, %v46_v17  ;;  %v56_v33 = vadd.f32 %v55_v30, %v54_v29 }
  0x99   :  { %v50_v20 = vsub.f32 %v48_v19, %v49_v18 }
  0x9b   :  { %v51_v22 = vmax.f32 %v50_v20, 0.0 }
  0x9d   :  { %v52_v24 = vmul.f32 1.0019569, %v51_v22 }
  0x9f   :  { %v59_v25 = vmul.f32 0.3, %v52_v24 }
  0xa1   :  { %v60_v26 = vadd.f32 %v59_v25, %v58_v23 }
  0xa3   :  { %v61_v27 = vadd.f32 1e-05, %v60_v26 }
  0xa5   :  { %125 = vrsqrt.f32 %v61_v27 }
  0xb2   :  { %v126_v32 = vpop.eup %125 }
  0xb3   :  { %v64_v34 = vmul.f32 %v126_v32, %v63_v31 }
  0xb5   :  { %70 = vperm.xlu1 %123, %v64_v34   ;;  %v66_v36 = vmul.f32 %v64_v34, %v56_v33 }
  0xb7   :  { %v67_v37 = vsub.f32 %v65_v35, %v66_v36 }
  0xb9   :  { %83 = vperm.xlu1 %123, %v67_v37  }
 0x130   :  { %v71_v44 = vpop.permute.xlu1 %70 }
 0x131   :  { %v78_v45 = vrot.slane %v71_v44, %v77_v43 }
 0x133   :  { %v80_v47 = vmul.f32 %v78_v45, %v21_v0  ;;  %v96_v48 = vmul.f32 %v116_v1, %v78_v45 }
 0x134   :  { %v84_v46 = vpop.permute.xlu1 %83 }
 0x135   :  { %v91_v49 = vrot.slane %v84_v46, %v77_v43 }
 0x137   :  { %v93_v50 = vadd.f32 %v91_v49, %v80_v47  ;;  %v97_v51 = vadd.f32 %v96_v48, %v91_v49 }
 0x139   :  { %94 = vst [vmem:[#allocation2] sm:$0xff] %v93_v50  ;;  %99 = vst [vmem:[#allocation2 + $0x8] sm:$0xff] %v97_v51 }
 0x13a   :  { %138 = shalt.err (!%p135_p4)
}
 0x13b   :  { %s152_s28 = smov 128   ;;  %s153_s29 = smov 8  }
 0x13c   :  { %111 = dma.vmem_to_hbm [thread:$0]  %s106_s3, 256, %s210_s5, [#allocation3], %s152_s28, %s152_s28, %s153_s29  }
 0x13d   :  { %147 = dma.done.wait [#allocation3], 256  }
 0x13e   :  { %148 = vsyncadd [#allocation3], 4294967040 }
 0x13f   :  { %115 = vsyncpa [#allocation3], 1 }

</bundles_post_ra>
